<compile_context>
chip_gen: v7x
topology: tpu7x:2x2x1
jax: 0.10.0
libtpu: 0.0.40
codegen_flags: <defaults>
</compile_context>

<pallas_src>
import functools

import numpy as np
import jax
import jax.numpy as jnp
from jax import lax
from jax.experimental import pallas as pl
from jax.experimental.pallas import tpu as pltpu


# --------------------------- Stage 1: input projection ---------------------------
def _input_proj_kernel(x_ref, w_ref, b_ref, gi_ref):
    # One large MXU-friendly GEMM: (T*N, D) @ (D, 8H) + (1, 8H).
    gi_ref[...] = (
        jnp.dot(x_ref[...], w_ref[...], preferred_element_type=jnp.float32)
        + b_ref[...]
    )


# ------------------------ Stage 2: fused bi-LSTM recurrence -----------------------
def _bilstm_recurrence_kernel(gi_ref, len_ref, whh_ref, out_ref, *, hidden_dim):
    T, N, _ = gi_ref.shape
    H = hidden_dim
    H4 = 4 * H

    lens = len_ref[...]          # (N, 1) int32
    whh_blk = whh_ref[...]       # (2H, 8H) block-diag [fwd gates | bwd gates]

    def lstm_act(gates, c):
        # PyTorch LSTM gate order: i, f, g, o
        i = jax.nn.sigmoid(gates[:, 0 * H:1 * H])
        f = jax.nn.sigmoid(gates[:, 1 * H:2 * H])
        g = jnp.tanh(gates[:, 2 * H:3 * H])
        o = jax.nn.sigmoid(gates[:, 3 * H:4 * H])
        c_new = f * c + i * g
        h_new = o * jnp.tanh(c_new)
        return h_new, c_new

    def step(t, carry):
        h_f, c_f, h_b, c_b = carry
        tb = T - 1 - t

        # Single fused recurrence matmul for both directions (block-diag trick).
        h_cat = jnp.concatenate([h_f, h_b], axis=1)                          # (N, 2H)
        rec = jnp.dot(h_cat, whh_blk, preferred_element_type=jnp.float32)    # (N, 8H)

        # Precomputed input projections: fwd at time t, bwd at time T-1-t.
        gates_f = gi_ref[t][:, :H4] + rec[:, :H4]
        gates_b = gi_ref[tb][:, H4:] + rec[:, H4:]

        hf_new, cf_new = lstm_act(gates_f, c_f)
        hb_new, cb_new = lstm_act(gates_b, c_b)

        # Length masks computed once per fused step, reused for store + carry.
        valid_f = lens > t          # (N, 1) bool
        valid_b = lens > tb

        # Single (T, N, 2H) output slab: fwd half / bwd half of each time row.
        out_ref[t, :, 0:H] = jnp.where(valid_f, hf_new, 0.0)
        out_ref[tb, :, H:2 * H] = jnp.where(valid_b, hb_new, 0.0)

        h_f = jnp.where(valid_f, hf_new, h_f)
        c_f = jnp.where(valid_f, cf_new, c_f)
        h_b = jnp.where(valid_b, hb_new, h_b)
        c_b = jnp.where(valid_b, cb_new, c_b)
        return h_f, c_f, h_b, c_b

    zeros = jnp.zeros((N, H), jnp.float32)
    lax.fori_loop(0, T, step, (zeros, zeros, zeros, zeros), unroll=2)


# --------------------------------- wrapper ----------------------------------------
def pblstm_forward(x, x_len, params, hidden_dim):
    """Equivalent of pBLSTM.forward. x: (T, N, D); x_len: (N,) int32.

    Returns (y, new_len): y is (T//2, N, 4*hidden_dim), new_len is (N,) int32.
    """
    T, N, D = x.shape
    H = hidden_dim
    wih_f, whh_f, b_f, wih_b, whh_b, b_b = params

    # Combined input-projection weight/bias: columns = [fwd i f g o | bwd i f g o].
    w_in = jnp.concatenate([wih_f, wih_b], axis=1)          # (D, 8H)
    b_in = jnp.concatenate([b_f, b_b], axis=1)              # (1, 8H)

    # Block-diagonal recurrence weight: rows [h_f | h_b] -> cols [fwd 4H | bwd 4H].
    whh_blk = jnp.zeros((2 * H, 8 * H), jnp.float32)
    whh_blk = whh_blk.at[:H, :4 * H].set(whh_f)
    whh_blk = whh_blk.at[H:, 4 * H:].set(whh_b)

    vmem = pl.BlockSpec(memory_space=pltpu.MemorySpace.VMEM)
    cparams = pltpu.CompilerParams(vmem_limit_bytes=32 * 1024 * 1024)

    # Stage 1: hoisted input projection (one big GEMM over all timesteps).
    gi2d = pl.pallas_call(
        _input_proj_kernel,
        out_shape=jax.ShapeDtypeStruct((T * N, 8 * H), jnp.float32),
        in_specs=[vmem, vmem, vmem],
        out_specs=vmem,
        compiler_params=cparams,
    )(x.reshape(T * N, D), w_in, b_in)
    gi = gi2d.reshape(T, N, 8 * H)

    # Stage 2: fused forward+backward recurrence.
    lens2d = x_len.reshape(N, 1).astype(jnp.int32)
    out = pl.pallas_call(
        functools.partial(_bilstm_recurrence_kernel, hidden_dim=H),
        out_shape=jax.ShapeDtypeStruct((T, N, 2 * H), jnp.float32),
        in_specs=[vmem, vmem, vmem],
        out_specs=vmem,
        compiler_params=cparams,
    )(gi, lens2d, whh_blk)

    # Pyramidal reshape (plain-JAX glue on the (T, N, 2H) slab).
    feature_dim = 2 * H
    max_len = T                      # assumes max(x_len) == T (see TODO at top)
    lens = x_len.astype(jnp.int32)
    if max_len % 2 != 0:
        out = out[:-1]
        # Clamp every affected length (safer generalization of PyTorch's argmax-only fix).
        lens = jnp.minimum(lens, max_len - 1)
        max_len -= 1
    new_len = lens // 2

    y = jnp.transpose(out, (1, 0, 2))                       # (N, T', 2H)
    y = y.reshape(N, max_len // 2, 2 * feature_dim)         # (N, T'//2, 4H)
    y = jnp.transpose(y, (1, 0, 2))                         # (T'//2, N, 4H)
    return y, new_len


# ----------------------- pure-JAX reference (for checking) ------------------------
def _ref_dir(x, lens, wih, whh, b, reverse):
    T, N, D = x.shape
    H = whh.shape[0]
    h = jnp.zeros((N, H), jnp.float32)
    c = jnp.zeros((N, H), jnp.float32)
    outs = [None] * T
    steps = range(T - 1, -1, -1) if reverse else range(T)
    for t in steps:
        gates = x[t] @ wih + h @ whh + b
        i = jax.nn.sigmoid(gates[:, 0 * H:1 * H])
        f = jax.nn.sigmoid(gates[:, 1 * H:2 * H])
        g = jnp.tanh(gates[:, 2 * H:3 * H])
        o = jax.nn.sigmoid(gates[:, 3 * H:4 * H])
        c_new = f * c + i * g
        h_new = o * jnp.tanh(c_new)
        valid = (lens > t)[:, None]
        h = jnp.where(valid, h_new, h)
        c = jnp.where(valid, c_new, c)
        outs[t] = jnp.where(valid, h_new, 0.0)
    return jnp.stack(outs, 0)


def _ref_pblstm(x, x_len, params, H):
    wih_f, whh_f, b_f, wih_b, whh_b, b_b = params
    of = _ref_dir(x, x_len, wih_f, whh_f, b_f, reverse=False)
    ob = _ref_dir(x, x_len, wih_b, whh_b, b_b, reverse=True)
    out = jnp.concatenate([of, ob], axis=-1)
    T, N, _ = x.shape
    max_len = T
    lens = x_len.astype(jnp.int32)
    if max_len % 2 != 0:
        out = out[:-1]
        lens = jnp.minimum(lens, max_len - 1)
        max_len -= 1
    y = jnp.transpose(out, (1, 0, 2)).reshape(N, max_len // 2, 4 * H)
    return jnp.transpose(y, (1, 0, 2)), lens // 2


if __name__ == "__main__":
    T, N, D, H = 8, 2, 16, 32

    key = jax.random.PRNGKey(0)
    keys = jax.random.split(key, 10)
    x = jax.random.normal(keys[0], (T, N, D), jnp.float32)
    x_len = jnp.array([8, 5], dtype=jnp.int32)

    bound = 1.0 / float(np.sqrt(H))

    def u(k_, shape):
        return jax.random.uniform(k_, shape, jnp.float32, -bound, bound)

    # PyTorch LSTM params (weight_ih: (4H, D), weight_hh: (4H, H)) stored transposed.
    wih_f = u(keys[1], (D, 4 * H))
    whh_f = u(keys[2], (H, 4 * H))
    b_f = (u(keys[3], (4 * H,)) + u(keys[4], (4 * H,))).reshape(1, 4 * H)
    wih_b = u(keys[5], (D, 4 * H))
    whh_b = u(keys[6], (H, 4 * H))
    b_b = (u(keys[7], (4 * H,)) + u(keys[8], (4 * H,))).reshape(1, 4 * H)
    params = (wih_f, whh_f, b_f, wih_b, whh_b, b_b)

    y, new_len = pblstm_forward(x, x_len, params, H)
    y = jax.block_until_ready(y)
    new_len = jax.block_until_ready(new_len)

    y_ref, len_ref = _ref_pblstm(x, x_len, params, H)
    assert y.shape == (T // 2, N, 4 * H), y.shape
    assert np.allclose(np.asarray(y), np.asarray(y_ref), atol=2e-5, rtol=2e-5)
    assert np.array_equal(np.asarray(new_len), np.asarray(len_ref))

    print("KERNEL_OK")
</pallas_src>

<mosaic_0001>
module attributes {stable_mosaic.version = 11 : i64} {
  func.func @_input_proj_kernel(%arg0: memref<16x16xf32, #tpu.memory_space<vmem>>, %arg1: memref<16x256xf32, #tpu.memory_space<vmem>>, %arg2: memref<1x256xf32, #tpu.memory_space<vmem>>, %arg3: memref<16x256xf32, #tpu.memory_space<vmem>>) attributes {dimension_semantics = [], scalar_prefetch = 0 : i64, scratch_operands = 0 : i64, tpu.core_type = #tpu.core_type<tc>} {
    %c0 = arith.constant 0 : index
    %c0_0 = arith.constant 0 : index
    %0 = vector.load %arg0[%c0, %c0_0] : memref<16x16xf32, #tpu.memory_space<vmem>>, vector<16x16xf32>
    %c0_1 = arith.constant 0 : index
    %c0_2 = arith.constant 0 : index
    %1 = vector.load %arg1[%c0_1, %c0_2] : memref<16x256xf32, #tpu.memory_space<vmem>>, vector<16x256xf32>
    %cst = arith.constant dense<0.000000e+00> : vector<16x256xf32>
    %2 = tpu.matmul %0, %1, %cst {dimension_numbers = #tpu.dot_dimension_numbers<[1], [0], [0], [1], [0, 0, 1, 1], [], []>} : vector<16x16xf32>, vector<16x256xf32>, vector<16x256xf32> -> vector<16x256xf32>
    %c0_3 = arith.constant 0 : index
    %c0_4 = arith.constant 0 : index
    %3 = vector.load %arg2[%c0_3, %c0_4] : memref<1x256xf32, #tpu.memory_space<vmem>>, vector<1x256xf32>
    %4 = vector.broadcast %3 : vector<1x256xf32> to vector<16x256xf32>
    %5 = arith.addf %2, %4 : vector<16x256xf32>
    %c0_5 = arith.constant 0 : index
    %c0_6 = arith.constant 0 : index
    %6 = vector.load %arg3[%c0_5, %c0_6] : memref<16x256xf32, #tpu.memory_space<vmem>>, vector<16x256xf32>
    tpu.vector_store %arg3[%c0_5, %c0_6], %5 {strides = array<i32>} : memref<16x256xf32, #tpu.memory_space<vmem>>, vector<16x256xf32>,
    return
  }
}

</mosaic_0001>

<bundles_post_ra>
// kernel: tpu_custom_call.1
= control target key start
LH: loop header
LB: loop body
LE: loop exit
PB: predicated region body
PF: predicated region fallthrough
CT: control target
= control target key end

     0   :  { %8 = vsyncpa [#allocation3], 0  ;;  %s328_s0 = inlined_call_operand.hbm [shape: f32[16,16], index: 0, kind: input, shape index: {}]   ;;  %s329_s1 = inlined_call_operand.hbm [shape: f32[16,256], index: 1, kind: input, shape index: {}]   ;;  %s330_s2 = inlined_call_operand.vmem [shape: f32[1,256], index: 2, kind: input, shape index: {}]   ;;  %s331_s3 = inlined_call_operand.hbm [shape: f32[16,256], index: 3, kind: output, shape index: {}]  }
   0x1   :  { %9 = vsyncpa [#allocation6], 0 }
   0x2   :  { %10 = vsyncpa [#allocation4], 0  ;;  %s255_s12 = smov [#allocation2]   ;;  %s183_s16 = scalar_lea.hbm %s328_s0, 256 }
   0x3   :  { %s16_s13 = sshll.u32 %s255_s12, 4  ;;  %p184_p0 = scmp.ne.s32.totalorder %s328_s0, %s183_s16  ;;  %s17_s13 = int_to_ptr.vmem [resolvable:$true] %s16_s13 }
   0x4   :  { %p187_p1 = scmp.lt.u32.totalorder %s183_s16, %s328_s0 }
   0x6   :  { %p189_p2 = pnand %p187_p1, %p184_p0 }
   0x8   :  { %192 = shalt.err (!%p189_p2)
}
   0x9   :  { %s193_s21 = scalar_lea.vmem %s17_s13, 256  ;;  %p198_p4 = scmp.lt.s32.totalorder %s17_s13, %s17_s13 }
   0xa   :  { %p194_p3 = scmp.ne.s32.totalorder %s17_s13, %s193_s21  ;;  %p199_p5 = scmp.lt.s32.totalorder %s193_s21, %s193_s21 }
   0xc   :  { %p200_p6 = por %p199_p5, %p198_p4 }
   0xe   :  { %p201_p7 = pnand %p200_p6, %p194_p3 }
  0x10   :  { %204 = shalt.err (!%p201_p7)
}
  0x11   :  { %s256_s22 = smov 128   ;;  %s257_s23 = smov 8  }
  0x12   :  { %22 = dma.hbm_to_vmem [thread:$0]  %s328_s0, 256, %s17_s13, [#allocation3], %s256_s22, %s256_s22, %s257_s23  }
  0x13   :  { %s258_s26 = smov [#allocation5]   ;;  %s205_s30 = scalar_lea.hbm %s329_s1, 512 }
  0x14   :  { %s28_s27 = sshll.u32 %s258_s26, 4  ;;  %p206_p8 = scmp.ne.s32.totalorder %s329_s1, %s205_s30  ;;  %s29_s27 = int_to_ptr.vmem [resolvable:$true] %s28_s27 }
  0x15   :  { %p209_p9 = scmp.lt.u32.totalorder %s205_s30, %s329_s1 }
  0x17   :  { %p211_p10 = pnand %p209_p9, %p206_p8 }
  0x19   :  { %214 = shalt.err (!%p211_p10)
}
  0x1a   :  { %s215_s8 = scalar_lea.vmem %s29_s27, 512  ;;  %p220_p12 = scmp.lt.s32.totalorder %s29_s27, %s29_s27 }
  0x1b   :  { %p216_p11 = scmp.ne.s32.totalorder %s29_s27, %s215_s8  ;;  %p221_p13 = scmp.lt.s32.totalorder %s215_s8, %s215_s8 }
  0x1d   :  { %p222_p0 = por %p221_p13, %p220_p12 }
  0x1f   :  { %p223_p1 = pnand %p222_p0, %p216_p11 }
  0x21   :  { %226 = shalt.err (!%p223_p1)
}
  0x22   :  { %s259_s0 = smov 256   ;;  %s260_s9 = smov 16  }
  0x23   :  { %34 = dma.hbm_to_vmem [thread:$0]  %s329_s1, 512, %s29_s27, [#allocation6], %s259_s0, %s259_s0, %s260_s9  }
  0x24   :  { %249 = dma.done.wait [#allocation3], 256  }
  0x25   :  { %250 = vsyncadd [#allocation3], 4294967040 }
  0x26   :  { %251 = dma.done.wait [#allocation6], 512  }
  0x27   :  { %252 = vsyncadd [#allocation6], 4294966784  ;;  %v261_v0 = vmov 0.0   ;;  %v46_v1 = vld [vmem:[#allocation5 + $0x8] sm:$0xff]  ;;  %v48_v2 = vld [vmem:[#allocation5 + $0x18] sm:$0xff]  ;;  %vm61_vm0 = vcmask 130048   ;;  %v51_v9 = vlaneseq }
  0x28   :  { %132 = vmatprep.mubr.f32.mxu0 %v261_v0  ;;  %138 = vmatprep.mubr.f32.mxu1 %v261_v0  ;;  %v45_v3 = vld [vmem:[#allocation5] sm:$0xff]  ;;  %v169_v4 = vpack.c.bf16 %v48_v2, %v46_v1  ;;  %v47_v5 = vld [vmem:[#allocation5 + $0x10] sm:$0xff]  ;;  %v44_v8 = vld [vmem:[#allocation2 + $0x8] sm:$0xff]  ;;  %s262_s13 = smov [#allocation7]  }
  0x29   :  { %v171_v6 = vpack.c.bf16 %v47_v5, %v45_v3  ;;  %v43_v7 = vld [vmem:[#allocation2] sm:$0xff]  ;;  %v52_v10 = vshrl.u32 %v51_v9, 7  ;;  %s154_s14 = sshll.u32 %s262_s13, 4  ;;  %s155_s14 = int_to_ptr.vmem [resolvable:$true] %s154_s14 }
  0x2a   :  { %170 = vmatprep.subr.bf16.mxu0 %v169_v4  ;;  %173 = vmatprep.subr.bf16.mxu1 %v169_v4  ;;  %v49_v12 = vld [vmem:[%s330_s2] sm:$0x3]  ;;  %s227_s15 = scalar_lea.vmem %s155_s14, 512  ;;  %p232_p3 = scmp.lt.s32.totalorder %s155_s14, %s155_s14 }
  0x2b   :  { %172 = vmatpush1.bf16.msra.mxu0 %v171_v6  ;;  %174 = vmatpush1.bf16.msra.mxu1 %v171_v6  ;;  %v53_v11 = vsub.s32 0, %v52_v10  ;;  %v57_v13 = vsub.s32 1, %v52_v10  ;;  %p228_p2 = scmp.ne.s32.totalorder %s155_s14, %s227_s15  ;;  %p233_p4 = scmp.lt.s32.totalorder %s227_s15, %s227_s15 }
  0x2d   :  { %v54_v14 = vrot.slane %v49_v12, %v53_v11  ;;  %v58_v15 = vrot.slane %v49_v12, %v57_v13  ;;  %p234_p5 = por %p233_p4, %p232_p3 }
  0x2e   :  { %167 = vmatmul.mubr.msk.f32.vlgmr.msra.gmra.mrb[0].mxu0 %vm61_vm0, %v43_v7  ;;  %168 = vmatmul.mubr.msk.f32.vlgmr.msra.gmra.mrb[0].mxu1 %vm61_vm0, %v44_v8 }
  0x2f   :  { %p235_p6 = pnand %p234_p5, %p228_p2 }
 0x101   :  { %v134_v16 = vpop.f32.mrb[0].mxu0  ;;  %v140_v17 = vpop.f32.mrb[0].mxu1 }
 0x102   :  { %v135_v18 = vadd.f32 %v134_v16, %v54_v14  ;;  %v141_v19 = vadd.f32 %v140_v17, %v54_v14  ;;  %v136_v20 = vpop.f32.mrb[1].mxu0  ;;  %v142_v21 = vpop.f32.mrb[1].mxu1 }
 0x103   :  { %v137_v22 = vadd.f32 %v136_v20, %v58_v15  ;;  %v143_v23 = vadd.f32 %v142_v21, %v58_v15 }
 0x104   :  { %145 = vst [vmem:[#allocation7] sm:$0xff] %v135_v18  ;;  %147 = vst [vmem:[#allocation7 + $0x10] sm:$0xff] %v141_v19 }
 0x105   :  { %146 = vst [vmem:[#allocation7 + $0x8] sm:$0xff] %v137_v22  ;;  %148 = vst [vmem:[#allocation7 + $0x18] sm:$0xff] %v143_v23 }
 0x106   :  { %238 = shalt.err (!%p235_p6)
}
 0x107   :  { %s239_s17 = scalar_lea.hbm %s331_s3, 512 }
 0x108   :  { %p240_p7 = scmp.ne.s32.totalorder %s331_s3, %s239_s17  ;;  %p243_p8 = scmp.lt.u32.totalorder %s239_s17, %s331_s3 }
 0x10a   :  { %p245_p9 = pnand %p243_p8, %p240_p7 }
 0x10c   :  { %248 = shalt.err (!%p245_p9)
}
 0x10d   :  { %160 = dma.vmem_to_hbm [thread:$0]  %s155_s14, 512, %s331_s3, [#allocation4], %s259_s0, %s259_s0, %s260_s9  }
 0x10e   :  { %253 = dma.done.wait [#allocation4], 512  }
 0x10f   :  { %254 = vsyncadd [#allocation4], 4294966784 }
 0x110   :  { %164 = vsyncpa [#allocation3], 1 }
 0x111   :  { %165 = vsyncpa [#allocation6], 1 }
 0x112   :  { %166 = vsyncpa [#allocation4], 1 }

</bundles_post_ra>
